<compile_context>
chip_gen: v7x
topology: tpu7x:2x2x1
jax: 0.10.0
libtpu: 0.0.40
codegen_flags: <defaults>
</compile_context>

<pallas_src>
import functools
import math

import jax
import jax.numpy as jnp
from jax import lax
from jax.experimental import pallas as pl
from jax.experimental.pallas import tpu as pltpu


def make_pe_table(max_len, model_dim, dtype=jnp.float32):
    """Sin/cos positional-encoding table matching the PyTorch buffer, shape (max_len, model_dim)."""
    position = jnp.arange(max_len, dtype=jnp.float32)[:, None]
    div_term = jnp.exp(
        jnp.arange(0, model_dim, 2, dtype=jnp.float32) * (-math.log(10000.0) / model_dim)
    )
    angles = position * div_term                       # (max_len, model_dim // 2)
    pe = jnp.zeros((max_len, model_dim), jnp.float32)
    pe = pe.at[:, 0::2].set(jnp.sin(angles))
    pe = pe.at[:, 1::2].set(jnp.cos(angles[:, : model_dim // 2]))
    return pe.astype(dtype)


def _pos_enc_kernel(seed_ref, x_ref, pe_ref, o_ref, *, p, training, seq_tile):
    # x_ref: (ts, B, D), pe_ref: (ts, 1, D) -> broadcast-add over the batch (sublane) axis.
    y = x_ref[...].astype(jnp.float32) + pe_ref[...].astype(jnp.float32)

    if training and p > 0.0:
        ts, b, d = x_ref.shape
        # Global element index (independent of tiling), then a murmur3-style
        # finalizer mixed with the seed.  All plain jnp ops -> portable lowering.
        base = (pl.program_id(0) * seq_tile).astype(jnp.uint32)
        s_idx = lax.broadcasted_iota(jnp.uint32, (ts, b, d), 0) + base
        b_idx = lax.broadcasted_iota(jnp.uint32, (ts, b, d), 1)
        d_idx = lax.broadcasted_iota(jnp.uint32, (ts, b, d), 2)
        lin = (s_idx * jnp.uint32(b) + b_idx) * jnp.uint32(d) + d_idx

        h = lin ^ (seed_ref[0].astype(jnp.uint32) * jnp.uint32(0x9E3779B9))
        h = h ^ (h >> jnp.uint32(16))
        h = h * jnp.uint32(0x85EBCA6B)
        h = h ^ (h >> jnp.uint32(13))
        h = h * jnp.uint32(0xC2B2AE35)
        h = h ^ (h >> jnp.uint32(16))

        # Top 24 bits -> exact uniform in [0, 1) as float32.
        u = (h >> jnp.uint32(8)).astype(jnp.float32) * jnp.float32(1.0 / (1 << 24))
        keep = u >= jnp.float32(p)
        y = jnp.where(keep, y * jnp.float32(1.0 / (1.0 - p)), jnp.float32(0.0))

    o_ref[...] = y.astype(o_ref.dtype)


def _round_up(a, b):
    return ((a + b - 1) // b) * b


def _pick_seq_tile(seq_len, batch, model_dim, itemsize):
    # ~4 MiB per x block -> double-buffered in + out blocks (+ tiny pe blocks)
    # total ~16-20 MiB VMEM: fits v5e/v6e (128 MiB) and v7x (64 MiB physical).
    target_block_bytes = 4 * 1024 * 1024
    row_bytes = max(batch * model_dim * itemsize, 1)
    align = 16 if itemsize <= 2 else 8          # bf16 sublane packing (v5e)
    ts = max(align, min(target_block_bytes // row_bytes, 1024))
    ts = (ts // align) * align
    ts = min(ts, _round_up(seq_len, align))
    # If a long sequence still fits a single block, split it so both v7x
    # TensorCores get work on the "parallel" grid axis.
    if seq_len > 256 and _round_up(seq_len, ts) // ts < 2:
        ts = max(align, _round_up((seq_len + 1) // 2, align))
    return ts


def positional_encoding(x, pe_table, *, dropout_p=0.1, training=False, seed=0, seq_tile=None):
    """y = dropout(x + pe_table[:seq_len][:, None, :]); x is (seq_len, batch, model_dim)."""
    seq_len, batch, model_dim = x.shape
    assert pe_table.shape[0] >= seq_len and pe_table.shape[1] == model_dim

    itemsize = jnp.dtype(x.dtype).itemsize
    if seq_tile is None:
        ts = _pick_seq_tile(seq_len, batch, model_dim, itemsize)
    else:
        align = 16 if itemsize <= 2 else 8
        ts = max(align, (int(seq_tile) // align) * align)
        ts = min(ts, _round_up(seq_len, align))

    # Pad the sequence up to a multiple of the tile (sliced off below) instead
    # of shrinking the tile to a divisor of seq_len.
    seq_pad = _round_up(seq_len, ts)
    xp = x
    pe = pe_table[:seq_len].astype(jnp.float32)
    if seq_pad != seq_len:
        xp = jnp.pad(xp, ((0, seq_pad - seq_len), (0, 0), (0, 0)))
        pe = jnp.pad(pe, ((0, seq_pad - seq_len), (0, 0)))
    pe = pe.reshape(seq_pad, 1, model_dim)

    seed_arr = jnp.asarray([seed], dtype=jnp.int32)
    grid = (seq_pad // ts,)

    kernel = functools.partial(
        _pos_enc_kernel, p=float(dropout_p), training=bool(training), seq_tile=ts
    )

    out = pl.pallas_call(
        kernel,
        out_shape=jax.ShapeDtypeStruct((seq_pad, batch, model_dim), x.dtype),
        grid=grid,
        in_specs=[
            pl.BlockSpec(memory_space=pltpu.MemorySpace.SMEM),            # dropout seed
            pl.BlockSpec((ts, batch, model_dim), lambda i: (i, 0, 0)),    # x
            pl.BlockSpec((ts, 1, model_dim), lambda i: (i, 0, 0)),        # pe (broadcast in-kernel)
        ],
        out_specs=pl.BlockSpec((ts, batch, model_dim), lambda i: (i, 0, 0)),
        compiler_params=pltpu.CompilerParams(
            dimension_semantics=("parallel",),      # megacore / 2-TC split on v7x
            vmem_limit_bytes=48 * 1024 * 1024,      # headroom over default scoped limit
        ),
    )(seed_arr, xp, pe)

    return out[:seq_len]


if __name__ == "__main__":
    key = jax.random.PRNGKey(0)
    seq_len, batch, model_dim, max_len = 20, 2, 128, 64   # lane-dense model_dim (multiple of 128)

    x = jax.random.normal(key, (seq_len, batch, model_dim), dtype=jnp.float32)
    pe_table = make_pe_table(max_len, model_dim)
    ref = x + pe_table[:seq_len][:, None, :]

    # 1) Eval mode (dropout identity), default (large) tile + seq padding path.
    out = jax.block_until_ready(positional_encoding(x, pe_table, dropout_p=0.1, training=False))
    assert out.shape == x.shape
    assert jnp.allclose(out, ref, atol=1e-6, rtol=1e-6), "eval mismatch vs reference"

    # 2) Eval mode with a forced small tile -> multi-step grid + padding (20 -> 24 rows, 3 tiles).
    out2 = jax.block_until_ready(
        positional_encoding(x, pe_table, dropout_p=0.1, training=False, seq_tile=8)
    )
    assert jnp.allclose(out2, ref, atol=1e-6, rtol=1e-6), "multi-tile mismatch vs reference"

    # 3) Training mode: in-kernel dropout. Every element must be 0 or the scaled
    #    (x+pe)/(1-p) value, and the drop fraction must be ~p.
    #    (Mask comes from a counter-based hash, so it is not bit-identical to torch's RNG.)
    p = 0.25
    out3 = jax.block_until_ready(
        positional_encoding(x, pe_table, dropout_p=p, training=True, seed=123)
    )
    scaled = ref * jnp.float32(1.0 / (1.0 - p))
    is_zero = jnp.isclose(out3, 0.0, atol=1e-6)
    is_scaled = jnp.isclose(out3, scaled, atol=1e-5, rtol=1e-5)
    assert bool(jnp.all(is_zero | is_scaled)), "dropout produced unexpected values"
    drop_frac = float(jnp.mean(is_zero.astype(jnp.float32)))
    assert abs(drop_frac - p) < 0.1, f"dropout rate off: {drop_frac} vs {p}"

    print("KERNEL_OK")
</pallas_src>

<mosaic_0001>
module attributes {stable_mosaic.version = 11 : i64} {
  func.func @_pos_enc_kernel(%arg0: i32, %arg1: memref<1xi32, #tpu.memory_space<smem>>, %arg2: memref<24x2x128xf32, #tpu.memory_space<vmem>>, %arg3: memref<24x1x128xf32, #tpu.memory_space<vmem>>, %arg4: memref<24x2x128xf32, #tpu.memory_space<vmem>>) attributes {dimension_semantics = [#tpu.dimension_semantics<parallel>], iteration_bounds = array<i64: 1>, scalar_prefetch = 0 : i64, scratch_operands = 0 : i64, tpu.core_type = #tpu.core_type<tc>, window_params = [{transform_indices = @transform_0, window_bounds = array<i64: 1>}, {transform_indices = @transform_1, window_bounds = array<i64: 24, 2, 128>}, {transform_indices = @transform_2, window_bounds = array<i64: 24, 1, 128>}, {transform_indices = @transform_3, window_bounds = array<i64: 24, 2, 128>}]} {
    %c0 = arith.constant 0 : index
    %c0_0 = arith.constant 0 : index
    %c0_1 = arith.constant 0 : index
    %0 = vector.load %arg2[%c0, %c0_0, %c0_1] : memref<24x2x128xf32, #tpu.memory_space<vmem>>, vector<24x2x128xf32>
    %c0_2 = arith.constant 0 : index
    %c0_3 = arith.constant 0 : index
    %c0_4 = arith.constant 0 : index
    %1 = vector.load %arg3[%c0_2, %c0_3, %c0_4] : memref<24x1x128xf32, #tpu.memory_space<vmem>>, vector<24x1x128xf32>
    %2 = vector.broadcast %1 : vector<24x1x128xf32> to vector<24x2x128xf32>
    %3 = arith.addf %0, %2 : vector<24x2x128xf32>
    %c0_5 = arith.constant 0 : index
    %c0_6 = arith.constant 0 : index
    %c0_7 = arith.constant 0 : index
    %4 = vector.load %arg4[%c0_5, %c0_6, %c0_7] : memref<24x2x128xf32, #tpu.memory_space<vmem>>, vector<24x2x128xf32>
    tpu.vector_store %arg4[%c0_5, %c0_6, %c0_7], %3 {strides = array<i32>} : memref<24x2x128xf32, #tpu.memory_space<vmem>>, vector<24x2x128xf32>,
    return
  }
  func.func @transform_0(%arg0: i32) -> i32 {
    %c0_i32 = arith.constant 0 : i32
    %c0_i32_0 = arith.constant 0 : i32
    return %c0_i32 : i32
  }
  func.func @transform_1(%arg0: i32) -> (i32, i32, i32) {
    %c0_i32 = arith.constant 0 : i32
    %c0_i32_0 = arith.constant 0 : i32
    %c0_i32_1 = arith.constant 0 : i32
    return %arg0, %c0_i32, %c0_i32_0 : i32, i32, i32
  }
  func.func @transform_2(%arg0: i32) -> (i32, i32, i32) {
    %c0_i32 = arith.constant 0 : i32
    %c0_i32_0 = arith.constant 0 : i32
    %c0_i32_1 = arith.constant 0 : i32
    return %arg0, %c0_i32, %c0_i32_0 : i32, i32, i32
  }
  func.func @transform_3(%arg0: i32) -> (i32, i32, i32) {
    %c0_i32 = arith.constant 0 : i32
    %c0_i32_0 = arith.constant 0 : i32
    %c0_i32_1 = arith.constant 0 : i32
    return %arg0, %c0_i32, %c0_i32_0 : i32, i32, i32
  }
}

</mosaic_0001>

<bundles_post_ra>
// kernel: tpu_custom_call.1
= control target key start
LH: loop header
LB: loop body
LE: loop exit
PB: predicated region body
PF: predicated region fallthrough
CT: control target
= control target key end

     0   :  { %9 = vsyncpa [#allocation4], 0  ;;  %s477_s0 = inlined_call_operand.<no memory space> [shape: s32[1], index: 0, kind: input, shape index: {}]   ;;  %s478_s1 = inlined_call_operand.hbm [shape: f32[24,2,128], index: 1, kind: input, shape index: {}]   ;;  %s479_s2 = inlined_call_operand.hbm [shape: f32[24,1,128], index: 2, kind: input, shape index: {}]   ;;  %s480_s3 = inlined_call_operand.hbm [shape: f32[24,2,128], index: 3, kind: output, shape index: {}]  }
   0x1   :  { %10 = vsyncpa [#allocation7], 0 }
   0x2   :  { %11 = vsyncpa [#allocation5], 0  ;;  %s405_s12 = smov [#allocation3]   ;;  %s333_s16 = scalar_lea.hbm %s478_s1, 768 }
   0x3   :  { %s19_s13 = sshll.u32 %s405_s12, 4  ;;  %p334_p0 = scmp.ne.s32.totalorder %s478_s1, %s333_s16  ;;  %s20_s13 = int_to_ptr.vmem [resolvable:$true] %s19_s13 }
   0x4   :  { %p337_p1 = scmp.lt.u32.totalorder %s333_s16, %s478_s1 }
   0x6   :  { %p339_p2 = pnand %p337_p1, %p334_p0 }
   0x8   :  { %342 = shalt.err (!%p339_p2)
}
   0x9   :  { %s343_s20 = scalar_lea.vmem %s20_s13, 768  ;;  %p348_p4 = scmp.lt.s32.totalorder %s20_s13, %s20_s13 }
   0xa   :  { %p344_p3 = scmp.ne.s32.totalorder %s20_s13, %s343_s20  ;;  %p349_p5 = scmp.lt.s32.totalorder %s343_s20, %s343_s20 }
   0xc   :  { %p350_p6 = por %p349_p5, %p348_p4 }
   0xe   :  { %p351_p7 = pnand %p350_p6, %p344_p3 }
  0x10   :  { %354 = shalt.err (!%p351_p7)
}
  0x11   :  { %s406_s21 = smov 32   ;;  %s407_s22 = smov 2  }
  0x12   :  { %25 = dma.hbm_to_vmem [thread:$0]  %s478_s1, 768, %s20_s13, [#allocation4], %s406_s21, %s406_s21, %s407_s22  }
  0x13   :  { %s408_s25 = smov [#allocation6]   ;;  %s355_s29 = scalar_lea.hbm %s479_s2, 384 }
  0x14   :  { %s31_s26 = sshll.u32 %s408_s25, 4  ;;  %p356_p8 = scmp.ne.s32.totalorder %s479_s2, %s355_s29  ;;  %s32_s26 = int_to_ptr.vmem [resolvable:$true] %s31_s26 }
  0x15   :  { %p359_p9 = scmp.lt.u32.totalorder %s355_s29, %s479_s2 }
  0x17   :  { %p361_p10 = pnand %p359_p9, %p356_p8 }
  0x19   :  { %364 = shalt.err (!%p361_p10)
}
  0x1a   :  { %s365_s7 = scalar_lea.vmem %s32_s26, 384  ;;  %p370_p12 = scmp.lt.s32.totalorder %s32_s26, %s32_s26 }
  0x1b   :  { %p366_p11 = scmp.ne.s32.totalorder %s32_s26, %s365_s7  ;;  %p371_p13 = scmp.lt.s32.totalorder %s365_s7, %s365_s7 }
  0x1d   :  { %p372_p0 = por %p371_p13, %p370_p12 }
  0x1f   :  { %p373_p1 = pnand %p372_p0, %p366_p11 }
  0x21   :  { %376 = shalt.err (!%p373_p1)
}
  0x22   :  { %s409_s1 = smov 16   ;;  %s410_s8 = smov 1  }
  0x23   :  { %37 = dma.hbm_to_vmem [thread:$0]  %s479_s2, 384, %s32_s26, [#allocation7], %s409_s1, %s409_s1, %s410_s8  }
  0x24   :  { %399 = dma.done.wait [#allocation4], 768  }
  0x25   :  { %400 = vsyncadd [#allocation4], 4294966528 }
  0x26   :  { %401 = dma.done.wait [#allocation7], 384  }
  0x27   :  { %402 = vsyncadd [#allocation7], 4294966912  ;;  %s411_s11 = smov [#allocation8]   ;;  %v44_v0 = vld [vmem:[#allocation3] sm:$0x3] }
  0x28   :  { %s459_s12 = sshll.u32 %s411_s11, 4  ;;  %v302_v1 = vld [vmem:[#allocation6] ss:$0 sm:$0xff]  ;;  %v45_v2 = vld [vmem:[#allocation3 + $0x2] sm:$0x3]  ;;  %s290_s12 = int_to_ptr.vmem [resolvable:$true] %s459_s12 }
  0x29   :  { %v236_v3 = vadd.f32 %v302_v1, %v44_v0  ;;  %v303_v4 = vld [vmem:[#allocation6 + $0x1] ss:$0 sm:$0xff]  ;;  %v46_v5 = vld [vmem:[#allocation3 + $0x4] sm:$0x3]  ;;  %v304_v6 = vld [vmem:[#allocation6 + $0x2] ss:$0 sm:$0xff]  ;;  %p382_p3 = scmp.lt.s32.totalorder %s290_s12, %s290_s12 }
  0x2a   :  { %v237_v7 = vadd.f32 %v303_v4, %v45_v2  ;;  %v238_v8 = vadd.f32 %v304_v6, %v46_v5  ;;  %v47_v9 = vld [vmem:[#allocation3 + $0x6] sm:$0x3]  ;;  %v305_v10 = vld [vmem:[#allocation6 + $0x3] ss:$0 sm:$0xff]  ;;  %v48_v11 = vld [vmem:[#allocation3 + $0x8] sm:$0x3] }
  0x2b   :  { %260 = vst [vmem:[#allocation8] sm:$0x3] %v236_v3  ;;  %v239_v12 = vadd.f32 %v305_v10, %v47_v9  ;;  %v306_v13 = vld [vmem:[#allocation6 + $0x4] ss:$0 sm:$0xff]  ;;  %v49_v14 = vld [vmem:[#allocation3 + $0xa] sm:$0x3] }
  0x2c   :  { %v307_v15 = vld [vmem:[#allocation6 + $0x5] ss:$0 sm:$0xff]  ;;  %261 = vst [vmem:[#allocation8 + $0x2] sm:$0x3] %v237_v7  ;;  %262 = vst [vmem:[#allocation8 + $0x4] sm:$0x3] %v238_v8  ;;  %v240_v16 = vadd.f32 %v306_v13, %v48_v11 }
  0x2d   :  { %v241_v17 = vadd.f32 %v307_v15, %v49_v14  ;;  %v50_v18 = vld [vmem:[#allocation3 + $0xc] sm:$0x3]  ;;  %v308_v19 = vld [vmem:[#allocation6 + $0x6] ss:$0 sm:$0xff]  ;;  %v51_v20 = vld [vmem:[#allocation3 + $0xe] sm:$0x3] }
  0x2e   :  { %263 = vst [vmem:[#allocation8 + $0x6] sm:$0x3] %v239_v12  ;;  %v242_v21 = vadd.f32 %v308_v19, %v50_v18  ;;  %v309_v22 = vld [vmem:[#allocation6 + $0x7] ss:$0 sm:$0xff]  ;;  %v52_v23 = vld [vmem:[#allocation3 + $0x10] sm:$0x3] }
  0x2f   :  { %v310_v24 = vld [vmem:[#allocation6 + $0x8] ss:$0 sm:$0xff]  ;;  %264 = vst [vmem:[#allocation8 + $0x8] sm:$0x3] %v240_v16  ;;  %265 = vst [vmem:[#allocation8 + $0xa] sm:$0x3] %v241_v17  ;;  %v243_v25 = vadd.f32 %v309_v22, %v51_v20 }
  0x30   :  { %v244_v26 = vadd.f32 %v310_v24, %v52_v23  ;;  %v53_v27 = vld [vmem:[#allocation3 + $0x12] sm:$0x3]  ;;  %v311_v28 = vld [vmem:[#allocation6 + $0x9] ss:$0 sm:$0xff]  ;;  %v54_v29 = vld [vmem:[#allocation3 + $0x14] sm:$0x3] }
  0x31   :  { %266 = vst [vmem:[#allocation8 + $0xc] sm:$0x3] %v242_v21  ;;  %v245_v30 = vadd.f32 %v311_v28, %v53_v27  ;;  %v312_v31 = vld [vmem:[#allocation6 + $0xa] ss:$0 sm:$0xff]  ;;  %v55_v32 = vld [vmem:[#allocation3 + $0x16] sm:$0x3] }
  0x32   :  { %v313_v33 = vld [vmem:[#allocation6 + $0xb] ss:$0 sm:$0xff]  ;;  %267 = vst [vmem:[#allocation8 + $0xe] sm:$0x3] %v243_v25  ;;  %268 = vst [vmem:[#allocation8 + $0x10] sm:$0x3] %v244_v26  ;;  %v246_v34 = vadd.f32 %v312_v31, %v54_v29 }
  0x33   :  { %v247_v35 = vadd.f32 %v313_v33, %v55_v32  ;;  %v56_v36 = vld [vmem:[#allocation3 + $0x18] sm:$0x3]  ;;  %v314_v37 = vld [vmem:[#allocation6 + $0xc] ss:$0 sm:$0xff]  ;;  %v57_v38 = vld [vmem:[#allocation3 + $0x1a] sm:$0x3] }
  0x34   :  { %269 = vst [vmem:[#allocation8 + $0x12] sm:$0x3] %v245_v30  ;;  %v248_v39 = vadd.f32 %v314_v37, %v56_v36  ;;  %v315_v40 = vld [vmem:[#allocation6 + $0xd] ss:$0 sm:$0xff]  ;;  %v316_v42 = vld [vmem:[#allocation6 + $0xe] ss:$0 sm:$0xff] }
  0x35   :  { %v58_v41 = vld [vmem:[#allocation3 + $0x1c] sm:$0x3]  ;;  %270 = vst [vmem:[#allocation8 + $0x14] sm:$0x3] %v246_v34  ;;  %271 = vst [vmem:[#allocation8 + $0x16] sm:$0x3] %v247_v35  ;;  %v249_v43 = vadd.f32 %v315_v40, %v57_v38 }
  0x36   :  { %v250_v44 = vadd.f32 %v316_v42, %v58_v41  ;;  %v59_v45 = vld [vmem:[#allocation3 + $0x1e] sm:$0x3]  ;;  %v60_v47 = vld [vmem:[#allocation3 + $0x20] sm:$0x3]  ;;  %272 = vst [vmem:[#allocation8 + $0x18] sm:$0x3] %v248_v39 }
  0x37   :  { %v317_v46 = vld [vmem:[#allocation6 + $0xf] ss:$0 sm:$0xff]  ;;  %v318_v49 = vld [vmem:[#allocation6 + $0x10] ss:$0 sm:$0xff]  ;;  %v61_v50 = vld [vmem:[#allocation3 + $0x22] sm:$0x3] }
  0x38   :  { %v251_v48 = vadd.f32 %v317_v46, %v59_v45  ;;  %v319_v51 = vld [vmem:[#allocation6 + $0x11] ss:$0 sm:$0xff]  ;;  %273 = vst [vmem:[#allocation8 + $0x1a] sm:$0x3] %v249_v43  ;;  %274 = vst [vmem:[#allocation8 + $0x1c] sm:$0x3] %v250_v44  ;;  %v252_v52 = vadd.f32 %v318_v49, %v60_v47 }
  0x39   :  { %v253_v53 = vadd.f32 %v319_v51, %v61_v50  ;;  %v62_v54 = vld [vmem:[#allocation3 + $0x24] sm:$0x3]  ;;  %v320_v55 = vld [vmem:[#allocation6 + $0x12] ss:$0 sm:$0xff]  ;;  %v63_v56 = vld [vmem:[#allocation3 + $0x26] sm:$0x3] }
  0x3a   :  { %275 = vst [vmem:[#allocation8 + $0x1e] sm:$0x3] %v251_v48  ;;  %v254_v57 = vadd.f32 %v320_v55, %v62_v54  ;;  %v321_v58 = vld [vmem:[#allocation6 + $0x13] ss:$0 sm:$0xff]  ;;  %v64_v59 = vld [vmem:[#allocation3 + $0x28] sm:$0x3] }
  0x3b   :  { %v322_v60 = vld [vmem:[#allocation6 + $0x14] ss:$0 sm:$0xff]  ;;  %276 = vst [vmem:[#allocation8 + $0x20] sm:$0x3] %v252_v52  ;;  %277 = vst [vmem:[#allocation8 + $0x22] sm:$0x3] %v253_v53  ;;  %v255_v61 = vadd.f32 %v321_v58, %v63_v56 }
  0x3c   :  { %v256_v62 = vadd.f32 %v322_v60, %v64_v59  ;;  %v65_v63 = vld [vmem:[#allocation3 + $0x2a] sm:$0x3]  ;;  %v323_v0 = vld [vmem:[#allocation6 + $0x15] ss:$0 sm:$0xff]  ;;  %v66_v1 = vld [vmem:[#allocation3 + $0x2c] sm:$0x3] }
  0x3d   :  { %278 = vst [vmem:[#allocation8 + $0x24] sm:$0x3] %v254_v57  ;;  %v257_v2 = vadd.f32 %v323_v0, %v65_v63  ;;  %v324_v3 = vld [vmem:[#allocation6 + $0x16] ss:$0 sm:$0xff]  ;;  %v67_v4 = vld [vmem:[#allocation3 + $0x2e] sm:$0x3] }
  0x3e   :  { %v325_v5 = vld [vmem:[#allocation6 + $0x17] ss:$0 sm:$0xff]  ;;  %279 = vst [vmem:[#allocation8 + $0x26] sm:$0x3] %v255_v61  ;;  %280 = vst [vmem:[#allocation8 + $0x28] sm:$0x3] %v256_v62  ;;  %v258_v6 = vadd.f32 %v324_v3, %v66_v1 }
  0x3f   :  { %v259_v7 = vadd.f32 %v325_v5, %v67_v4  ;;  %281 = vst [vmem:[#allocation8 + $0x2a] sm:$0x3] %v257_v2  ;;  %s377_s2 = scalar_lea.vmem %s290_s12, 768 }
  0x40   :  { %282 = vst [vmem:[#allocation8 + $0x2c] sm:$0x3] %v258_v6  ;;  %p378_p2 = scmp.ne.s32.totalorder %s290_s12, %s377_s2  ;;  %p383_p4 = scmp.lt.s32.totalorder %s377_s2, %s377_s2 }
  0x41   :  { %283 = vst [vmem:[#allocation8 + $0x2e] sm:$0x3] %v259_v7 }
  0x42   :  { %p384_p5 = por %p383_p4, %p382_p3 }
  0x44   :  { %p385_p6 = pnand %p384_p5, %p378_p2 }
  0x46   :  { %388 = shalt.err (!%p385_p6)
}
  0x47   :  { %s389_s15 = scalar_lea.hbm %s480_s3, 768 }
  0x48   :  { %p390_p7 = scmp.ne.s32.totalorder %s480_s3, %s389_s15  ;;  %p393_p8 = scmp.lt.u32.totalorder %s389_s15, %s480_s3 }
  0x4a   :  { %p395_p9 = pnand %p393_p8, %p390_p7 }
  0x4c   :  { %398 = shalt.err (!%p395_p9)
}
  0x4d   :  { %295 = dma.vmem_to_hbm [thread:$0]  %s290_s12, 768, %s480_s3, [#allocation5], %s406_s21, %s406_s21, %s407_s22  }
  0x4e   :  { %403 = dma.done.wait [#allocation5], 768  }
  0x4f   :  { %404 = vsyncadd [#allocation5], 4294966528 }
  0x50   :  { %299 = vsyncpa [#allocation4], 1 }
  0x51   :  { %300 = vsyncpa [#allocation7], 1 }
  0x52   :  { %301 = vsyncpa [#allocation5], 1 }

</bundles_post_ra>
